<compile_context>
chip_gen: v5e
topology: v5e:2x2
jax: 0.10.0
libtpu: 0.0.40
codegen_flags: <defaults>
</compile_context>

<pallas_src>
import numpy as np
import jax
import jax.numpy as jnp
from jax.experimental import pallas as pl
from jax.experimental.pallas import tpu as pltpu


def _make_stft_kernel(Tt, hop, R):
    def kernel(seg_ref, basis_ref, out_ref):
        # seg_ref:   (Tt + R - 1, hop)  non-overlapping hop-sized chunks (+ halo)
        # basis_ref: (win_len, Np)      [win*cos | -win*sin | zero pad]
        # out_ref:   (Tt, Np)           fp32, lane-dense (Np % 128 == 0)
        seg = seg_ref[...]
        acc = None
        for r in range(R):
            term = jnp.dot(
                seg[r:r + Tt, :],
                basis_ref[r * hop:(r + 1) * hop, :],
                preferred_element_type=jnp.float32,
            )
            acc = term if acc is None else acc + term
        out_ref[...] = acc

    return kernel


def stft_pallas(signal, win_len, win_shift_ratio, nfft, win="hann", tile_nt=256):
    """signal: (nbatch, nsample, nch) float -> (nbatch, nf, nt, nch) complex64."""
    nb, nsample, nch = signal.shape
    # Matches the module's `int(win_len * win_shift_ratio)` truncation semantics.
    hop = int(win_len * win_shift_ratio)
    nf = nfft // 2 + 1
    nt = int(np.floor((nsample - win_len) / hop + 1))

    assert nsample >= win_len, "signal shorter than one window"
    # TODO(synk): the reference module's nt formula (and its output buffer) only match
    # torch.stft when win_len == nfft; the zero-padded win_len < nfft case is excluded.
    assert win_len == nfft, "STFT kernel assumes win_len == nfft"
    # TODO(synk): non-integer overlap ratios (win_len % hop != 0) would need a strided
    # in-kernel frame build; the chunk-decomposition path requires win_len % hop == 0.
    assert win_len % hop == 0, "STFT kernel assumes win_len % hop == 0"
    R = win_len // hop

    # ---- host-precomputed DFT basis (float64, exact integer angle reduction) ----
    Np = ((2 * nf + 127) // 128) * 128  # lane-dense padded output width
    k = np.arange(win_len)
    f = np.arange(nf)
    if win == "hann":
        # torch.hann_window default periodic=True
        window = 0.5 - 0.5 * np.cos(2.0 * np.pi * k / win_len)
    elif win == "boxcar":
        window = np.ones((win_len,), np.float64)
    else:
        raise ValueError(f"unsupported window: {win}")
    ang = 2.0 * np.pi * ((k[:, None] * f[None, :]) % nfft) / nfft  # exact reduction
    basis_np = np.zeros((win_len, Np), np.float32)
    basis_np[:, :nf] = (window[:, None] * np.cos(ang)).astype(np.float32)
    basis_np[:, nf:2 * nf] = (-window[:, None] * np.sin(ang)).astype(np.float32)
    basis = jnp.asarray(basis_np)

    # ---- nt tiling ----
    Tt = int(min(tile_nt, ((nt + 7) // 8) * 8))   # multiple of 8, capped at tile_nt
    nt_tiles = -(-nt // Tt)
    nt_pad = nt_tiles * Tt
    Tseg = Tt + R - 1                              # chunks per tile incl. halo
    n_chunks_pad = nt_pad + R - 1

    # ---- glue: (nb, nsample, nch) -> halo chunk tiles (B, nt_tiles, Tseg, hop) ----
    B = nb * nch
    sig = jnp.transpose(signal.astype(jnp.float32), (0, 2, 1)).reshape(B, nsample)
    total = n_chunks_pad * hop
    if total >= nsample:
        sig = jnp.pad(sig, ((0, 0), (0, total - nsample)))
    else:
        sig = sig[:, :total]
    chunks = sig.reshape(B, n_chunks_pad, hop)
    tile_idx = jnp.arange(nt_tiles)[:, None] * Tt + jnp.arange(Tseg)[None, :]
    seg = chunks[:, tile_idx, :]                   # (B, nt_tiles, Tseg, hop)

    kernel = _make_stft_kernel(Tt, hop, R)
    out = pl.pallas_call(
        kernel,
        out_shape=jax.ShapeDtypeStruct((B, nt_pad, Np), jnp.float32),
        grid=(B, nt_tiles),
        in_specs=[
            # halo chunk tile for this (b, nt-tile); leading dims squeezed
            pl.BlockSpec((None, None, Tseg, hop), lambda b, ti: (b, ti, 0, 0)),
            # basis stays VMEM-resident across the whole grid (constant block index)
            pl.BlockSpec((win_len, Np), lambda b, ti: (0, 0)),
        ],
        out_specs=pl.BlockSpec((None, Tt, Np), lambda b, ti: (b, ti, 0)),
        compiler_params=pltpu.CompilerParams(
            dimension_semantics=("parallel", "parallel")),
    )(seg, basis)

    # ---- epilogue: drop padding, form complex64, reshape to module layout ----
    re = out[:, :nt, :nf]
    im = out[:, :nt, nf:2 * nf]
    spec = jax.lax.complex(re, im).reshape(nb, nch, nt, nf)
    return jnp.transpose(spec, (0, 3, 2, 1))       # (nb, nf, nt, nch)


if __name__ == "__main__":
    # Small, deterministic example consistent with the module's forward.
    nb, nsample, nch = 2, 160, 4
    win_len = 32
    nfft = 32
    win_shift_ratio = 0.5

    key = jax.random.PRNGKey(0)
    signal = jax.random.normal(key, (nb, nsample, nch), dtype=jnp.float32)

    stft = stft_pallas(signal, win_len, win_shift_ratio, nfft, win="hann")
    stft = jax.block_until_ready(stft)

    # Reference check against jnp.fft.rfft of the Hann-windowed frames.
    hop = int(win_len * win_shift_ratio)
    nf = nfft // 2 + 1
    nt = int(np.floor((nsample - win_len) / hop + 1))
    n = jnp.arange(win_len, dtype=jnp.float32)
    window = 0.5 - 0.5 * jnp.cos(2.0 * jnp.pi * n / win_len)
    starts = jnp.arange(nt) * hop
    idx = starts[:, None] + jnp.arange(win_len)[None, :]
    frames = signal[:, idx, :]                                    # (nb, nt, win_len, nch)
    ref = jnp.fft.rfft(frames * window[None, None, :, None], n=nfft, axis=2)
    ref = jnp.transpose(ref, (0, 2, 1, 3))                        # (nb, nf, nt, nch)

    assert stft.shape == (nb, nf, nt, nch), stft.shape
    assert stft.dtype == jnp.complex64, stft.dtype
    np.testing.assert_allclose(np.asarray(stft), np.asarray(ref), rtol=1e-4, atol=1e-4)
    print("KERNEL_OK")
</pallas_src>

<mosaic_0001>
module attributes {stable_mosaic.version = 11 : i64} {
  func.func @kernel(%arg0: i32, %arg1: i32, %arg2: memref<1x1x17x16xf32, #tpu.memory_space<vmem>>, %arg3: memref<32x128xf32, #tpu.memory_space<vmem>>, %arg4: memref<1x16x128xf32, #tpu.memory_space<vmem>>) attributes {dimension_semantics = [#tpu.dimension_semantics<parallel>, #tpu.dimension_semantics<parallel>], iteration_bounds = array<i64: 8, 1>, scalar_prefetch = 0 : i64, scratch_operands = 0 : i64, tpu.core_type = #tpu.core_type<tc>, window_params = [{transform_indices = @transform_0, window_bounds = array<i64: 1, 1, 17, 16>}, {pipeline_mode = #tpu.pipeline_mode<synchronous>, transform_indices = @transform_1, window_bounds = array<i64: 32, 128>}, {transform_indices = @transform_2, window_bounds = array<i64: 1, 16, 128>}]} {
    %c0 = arith.constant 0 : index
    %c0_0 = arith.constant 0 : index
    %c0_1 = arith.constant 0 : index
    %c0_2 = arith.constant 0 : index
    %0 = vector.load %arg2[%c0, %c0_0, %c0_1, %c0_2] : memref<1x1x17x16xf32, #tpu.memory_space<vmem>>, vector<1x1x17x16xf32>
    %1 = vector.shape_cast %0 : vector<1x1x17x16xf32> to vector<17x16xf32>
    %2 = vector.extract_strided_slice %1 {offsets = [0, 0], sizes = [16, 16], strides = [1, 1]} : vector<17x16xf32> to vector<16x16xf32>
    %c0_3 = arith.constant 0 : index
    %c0_4 = arith.constant 0 : index
    %3 = vector.load %arg3[%c0_3, %c0_4] : memref<32x128xf32, #tpu.memory_space<vmem>>, vector<16x128xf32>
    %cst = arith.constant dense<0.000000e+00> : vector<16x128xf32>
    %4 = tpu.matmul %2, %3, %cst {dimension_numbers = #tpu.dot_dimension_numbers<[1], [0], [0], [1], [0, 0, 1, 1], [], []>} : vector<16x16xf32>, vector<16x128xf32>, vector<16x128xf32> -> vector<16x128xf32>
    %5 = vector.extract_strided_slice %1 {offsets = [1, 0], sizes = [16, 16], strides = [1, 1]} : vector<17x16xf32> to vector<16x16xf32>
    %c16 = arith.constant 16 : index
    %c0_5 = arith.constant 0 : index
    %6 = vector.load %arg3[%c16, %c0_5] : memref<32x128xf32, #tpu.memory_space<vmem>>, vector<16x128xf32>
    %cst_6 = arith.constant dense<0.000000e+00> : vector<16x128xf32>
    %7 = tpu.matmul %5, %6, %cst_6 {dimension_numbers = #tpu.dot_dimension_numbers<[1], [0], [0], [1], [0, 0, 1, 1], [], []>} : vector<16x16xf32>, vector<16x128xf32>, vector<16x128xf32> -> vector<16x128xf32>
    %8 = arith.addf %4, %7 : vector<16x128xf32>
    %c0_7 = arith.constant 0 : index
    %c0_8 = arith.constant 0 : index
    %c0_9 = arith.constant 0 : index
    %9 = vector.load %arg4[%c0_7, %c0_8, %c0_9] : memref<1x16x128xf32, #tpu.memory_space<vmem>>, vector<1x16x128xf32>
    %10 = vector.shape_cast %9 : vector<1x16x128xf32> to vector<16x128xf32>
    %11 = vector.shape_cast %8 : vector<16x128xf32> to vector<1x16x128xf32>
    tpu.vector_store %arg4[%c0_7, %c0_8, %c0_9], %11 {strides = array<i32>} : memref<1x16x128xf32, #tpu.memory_space<vmem>>, vector<1x16x128xf32>,
    return
  }
  func.func @transform_0(%arg0: i32, %arg1: i32) -> (i32, i32, i32, i32) {
    %c0_i32 = arith.constant 0 : i32
    %c0_i32_0 = arith.constant 0 : i32
    %c0_i32_1 = arith.constant 0 : i32
    return %arg0, %arg1, %c0_i32, %c0_i32_0 : i32, i32, i32, i32
  }
  func.func @transform_1(%arg0: i32, %arg1: i32) -> (i32, i32) {
    %c0_i32 = arith.constant 0 : i32
    %c0_i32_0 = arith.constant 0 : i32
    %c0_i32_1 = arith.constant 0 : i32
    return %c0_i32, %c0_i32_0 : i32, i32
  }
  func.func @transform_2(%arg0: i32, %arg1: i32) -> (i32, i32, i32) {
    %c0_i32 = arith.constant 0 : i32
    %c0_i32_0 = arith.constant 0 : i32
    return %arg0, %arg1, %c0_i32 : i32, i32, i32
  }
}

</mosaic_0001>

<bundles_post_ra>
// kernel: tpu_custom_call.1
= control target key start
LH: loop header
LB: loop body
LE: loop exit
PB: predicated region body
PF: predicated region fallthrough
CT: control target
= control target key end

     0   :  { %7 = vsyncpa [#allocation3], 0  ;;  %s629_s0 = inlined_call_operand.vmem [shape: f32[8,1,17,16], index: 0, kind: input, shape index: {}]   ;;  %s630_s1 = inlined_call_operand.vmem [shape: f32[32,128], index: 1, kind: input, shape index: {}]   ;;  %s631_s2 = inlined_call_operand.hbm [shape: f32[8,16,128], index: 2, kind: output, shape index: {}]  }
   0x1   :  { %9 = vsyncpa [#allocation3 + $0x1], 0  ;;  %s520_s9 = smov 0   ;;  %s522_s10 = smov 0  }
   0x2   :  { %s524_s11 = smov 0   ;;  %s526_s12 = smov 0  }
   0x3   :  { %s528_s13 = smov 0   ;;  %s530_s14 = smov 0  }
   0x4 LB: > { %s344_s15 = sadd.s32 4294967295, %s501_s14   ;;  %s345_s16 = sadd.s32 4294967294, %s501_s14   ;;  %s501_s14 = sphi %s530_s14, %s15_s14   ;;  %s497_s13 = sphi %s528_s13, %s638_s13   ;;  %s493_s12 = sphi %s526_s12, %s637_s12   ;;  %s489_s11 = sphi %s524_s11, %s636_s11   ;;  %s485_s10 = sphi %s522_s10, %s635_s10   ;;  %s481_s9 = sphi %s520_s9, %s634_s9  }
   0x5   : > { %s27_s17 = sadd.s32 1, %s497_s13  ;;  %s85_s18 = sadd.s32 1, %s489_s11 }
   0x6   : > { %p29_p0 = scmp.ge.s32.totalorder %s27_s17, 8  ;;  %p95_p1 = scmp.ne.s32.totalorder %s489_s11, %s485_s10 }
   0x7   : > { %p96_p2 = scmp.eq.s32.totalorder %s344_s15, 7  ;;  %p101_p3 = scmp.ne.s32.totalorder %s485_s10, %s481_s9 }
   0x8   : > { %s640_s17 = smov (%p29_p0, %s27_s17), 0  ;;  %p102_p5 = scmp.eq.s32.totalorder %s345_s16, 7 }
   0x9   : > { %p560_p4 = por %p96_p2, %p95_p1  ;;  %s80_s20 = ssub.s32 %s497_s13, %s640_s17 }
   0xa   : > { %p348_p6 = scmp.ge.s32.totalorder %s501_s14, 1  ;;  %p83_p7 = scmp.eq.s32.totalorder %s80_s20, 0 }
   0xb   : > { %p567_p8 = por %p102_p5, %p101_p3  ;;  %p135_p9 = scmp.lt.s32.totalorder %s501_s14, 9 }
   0xc   : > { %s573_s22 = scalar_select %p83_p7, %s489_s11, %s85_s18  }
   0xd   : > { %p136_p10 = pnand %p348_p6, %p135_p9 }
   0xe   : > { %p161_p11 = scmp.lt.s32.totalorder (!%p136_p10), %s493_s12, 7  ;;  %s158_s8 = sand.u32 (!%p136_p10), 1, %s485_s10  }
   0xf   : > { %139 = sbr.rel (%p136_p10) target bundleno = 167 (0xa7), region = 28  ;;  %s349_s15 = sshll.u32 (!%p136_p10), %s158_s8, 4 }
  0x10   : > { %s360_s16 = sshll.u32 (!%p136_p10), %s493_s12, 4  ;;  %s160_s24 = scalar_lea.vmem (!%p136_p10), [#allocation2], %s349_s15 }
  0x11   : > { %s258_s23 = scalar_lea.hbm (!%p136_p10), %s631_s2, %s360_s16  ;;  %s259_s25 = sshll.u32 (!%p136_p10), %s160_s24, 4  ;;  %s260_s25 = int_to_ptr.vmem [resolvable:$true] %s259_s25 }
  0x12   : > { %s261_s26 = sshll.u32 (!%p136_p10), %s258_s23, 4  ;;  %s245_s27 = scalar_lea.sflag (!%p136_p10), [#allocation3], %s158_s8  ;;  %s262_s26 = int_to_ptr.hbm [resolvable:$true] %s261_s26 }
  0x14   : > { %v177_v0 = vld [vmem:[%s630_s1 + $0x18] sm:$0xff]  ;;  %v175_v1 = vld [vmem:[%s630_s1 + $0x8] sm:$0xff]  ;;  %v176_v2 = vld [vmem:[%s630_s1 + $0x10] sm:$0xff]  ;;  %s162_s3 = scalar_select %p161_p11, %s493_s12, 7  ;;  %vm187_vm0 = vcmask 130048   ;;  %vm181_vm1 = vcmask 1046528  }
  0x15   : > { %361 = vmatpush.msra.mxu2 %v177_v0  ;;  %363 = vmatpush.msra.mxu3 %v175_v1  ;;  %v174_v3 = vld [vmem:[%s630_s1] sm:$0xff]  ;;  %s437_s12 = sshra.s32 %s262_s26, 4  ;;  %s438_s12 = int_to_ptr.hbm [resolvable:$true] %s437_s12 }
  0x16   : > { %206 = vmatpush.msra.mxu0 %v177_v0  ;;  %233 = vmatpush.msra.mxu1 %v175_v1  ;;  %s365_s4 = smul.u32 24, %s162_s3  ;;  %s439_s28 = scalar_lea.hbm %s438_s12, 16 }
  0x17   : > { %362 = vmatpush.msra.mxu2 %v176_v2  ;;  %364 = vmatpush.msra.mxu3 %v174_v3  ;;  %p440_p12 = scmp.ne.s32.totalorder %s438_s12, %s439_s28  ;;  %s443_s3 = scalar_lea.hbm %s631_s2, 128 }
  0x18   : > { %207 = vmatpush.msra.mxu0 %v176_v2  ;;  %234 = vmatpush.msra.mxu1 %v174_v3  ;;  %s169_s7 = scalar_lea.vmem %s629_s0, %s365_s4  ;;  %p444_p1 = scmp.lt.s32.totalorder %s438_s12, %s631_s2 }
  0x19   : > { %v172_v4 = vld [vmem:[%s169_s7 + $0x8] sm:$0xff]  ;;  %v173_v5 = vld [vmem:[%s169_s7 + $0x10] sm:$0x1]  ;;  %v171_v6 = vld [vmem:[%s169_s7] sm:$0xff]  ;;  %p441_p13 = pnand %p440_p12, %p560_p4  ;;  %p445_p2 = scmp.lt.s32.totalorder %s443_s3, %s439_s28 }
  0x1a   : > { %v183_v7 = vrot.slane %v172_v4, 1  ;;  %v185_v8 = vrot.slane %v173_v5, 1  ;;  %354 = vmatmul.msk.f32.vlgmr.msra.gmra.mxu3 %vm187_vm0, %v172_v4  ;;  %v182_v9 = vrot.slane %v171_v6, 1  ;;  %353 = vmatmul.msk.f32.vlgmr.msra.gmra.mxu1 %vm187_vm0, %v171_v6 }
  0x1b   : > { %p442_p0 = pneg %p441_p13  ;;  %p446_p3 = por %p445_p2, %p444_p1 }
  0x1c   : > { %v186_v10 = vsel %vm181_vm1, %v183_v7, %v185_v8  ;;  %v184_v11 = vsel %vm181_vm1, %v182_v9, %v183_v7 }
  0x1d   : > { %352 = vmatmul.msk.f32.vlgmr.msra.gmra.mxu2 %vm187_vm0, %v186_v10  ;;  %351 = vmatmul.msk.f32.vlgmr.msra.gmra.mxu0 %vm187_vm0, %v184_v11  ;;  %p447_p5 = pnand %p446_p3, %p442_p0 }
  0x97   : > { %v236_v12 = vpop.f32.mrf.mxu1 }
  0x9a   : > { %v209_v13 = vpop.f32.mrf.mxu0 }
  0x9b   : > { %v237_v14 = vadd.f32 %v236_v12, %v209_v13 }
  0x9d   : > { %242 = vst [vmem:[%s160_s24] sm:$0xff] %v237_v14  ;;  %v239_v15 = vpop.f32.mrf.mxu3 }
  0xa0   : > { %v212_v16 = vpop.f32.mrf.mxu2 }
  0xa1   : > { %v240_v17 = vadd.f32 %v239_v15, %v212_v16 }
  0xa3   : > { %243 = vst [vmem:[%s160_s24 + $0x8] sm:$0xff] %v240_v17 }
  0xa4   : > { %450 = shalt.err (!%p447_p5)
}
  0xa5   : > { %s503_s6 = smov 128   ;;  %s504_s7 = smov 8  }
  0xa6   : > { %366 = dma.vmem_to_hbm [thread:$0]  (%p560_p4), %s260_s25, 256, %s262_s26, %s245_s27, %s503_s6, %s503_s6, %s504_s7  }
  0xa7 PF: > { %p372_p6 = scmp.ge.s32.totalorder %s501_s14, 2  ;;  %s276_s8 = sand.u32 1, %s481_s9  }
  0xa8   : > { %s277_s15 = scalar_lea.sflag [#allocation3], %s276_s8 }
  0xa9   : > { %p369_p7 = pnand %p372_p6, %p567_p8 }
  0xab   : > { %p370_p9 = pneg %p369_p7 }
  0xad   : > { %476 = dma.done.wait (%p370_p9), %s277_s15, 256  }
  0xae   : > { %478 = vsyncadd (%p370_p9), %s277_s15, 4294967040  ;;  %s15_s14 = sadd.s32 1, %s501_s14   ;;  %s634_s9 = smov %s485_s10 }
  0xaf   : > { %p12_p10 = scmp.ge.s32.totalorder %s15_s14, 10   ;;  %s635_s10 = smov %s489_s11 }
  0xb0   : > { %s636_s11 = smov %s573_s22  ;;  %s637_s12 = smov %s497_s13 }
  0xb1   : > { %s638_s13 = smov %s640_s17  ;;  %14 = sbr.rel (!%p12_p10) target bundleno = 4 (0x4), region = 63 }
  0xb6   :  { %283 = vsyncpa [#allocation3], 1 }
  0xb7   :  { %285 = vsyncpa [#allocation3 + $0x1], 1 }

</bundles_post_ra>
